<compile_context>
chip_gen: v7x
topology: tpu7x:2x2x1
jax: 0.10.0
libtpu: 0.0.40
codegen_flags: <defaults>
</compile_context>

<pallas_src>
import functools
import math

import jax
import jax.numpy as jnp
from jax import lax
from jax.experimental import pallas as pl
from jax.experimental.pallas import tpu as pltpu

BN_EPS = 1e-5


# ----------------------------------------------------------------------------
# Pass 1: conv GEMM (bf16 MXU, f32 acc) + bias + per-channel sum / sum-of-sq.
# ----------------------------------------------------------------------------
def _conv_stats_kernel(w_ref, b_ref, p_ref, y_ref, s_ref, ss_ref, *,
                       tile_m, m_true):
    # w_ref:  (Cout, KPAD)    bf16   conv weight (transposed, K-padded)
    # b_ref:  (Cout, 1)       f32    conv bias
    # p_ref:  (KPAD, TILE_M)  bf16   im2col patch tile (transposed)
    # y_ref:  (Cout, TILE_M)  f32    conv output tile (lane-dense)
    # s_ref:  (Cout, 1)       f32    running per-channel sum     (revisited)
    # ss_ref: (Cout, 1)       f32    running per-channel sum-sq  (revisited)
    i = pl.program_id(0)

    acc = jnp.dot(w_ref[...], p_ref[...], preferred_element_type=jnp.float32)
    acc = acc + b_ref[...]                       # (Cout,1) broadcast over lanes
    y_ref[...] = acc

    # Mask out the zero-padded M columns so they do not pollute the stats.
    col = i * tile_m + lax.broadcasted_iota(jnp.int32, acc.shape, 1)
    accv = jnp.where(col < m_true, acc, 0.0)

    @pl.when(i == 0)
    def _():
        s_ref[...] = jnp.zeros_like(s_ref)
        ss_ref[...] = jnp.zeros_like(ss_ref)

    s_ref[...] += jnp.sum(accv, axis=1, keepdims=True)
    ss_ref[...] += jnp.sum(accv * accv, axis=1, keepdims=True)


# ----------------------------------------------------------------------------
# Pass 2: BatchNorm (batch stats) normalize + ReLU, fused FMA per element.
# ----------------------------------------------------------------------------
def _bn_relu_kernel(y_ref, s_ref, ss_ref, g_ref, bt_ref, o_ref, *, m_true):
    inv_m = 1.0 / float(m_true)
    mean = s_ref[...] * inv_m                    # (Cout, 1)
    var = ss_ref[...] * inv_m - mean * mean      # biased batch variance
    scale = g_ref[...] * lax.rsqrt(var + BN_EPS)
    shift = bt_ref[...] - mean * scale
    o_ref[...] = jnp.maximum(y_ref[...] * scale + shift, 0.0).astype(o_ref.dtype)


# ----------------------------------------------------------------------------
# Plain-JAX glue: transposed im2col -> (k^3*Cin, N*D*H*W), feature-major rows.
# ----------------------------------------------------------------------------
def _im2col_transposed(x_ncdhw, k, pad, dtype):
    n, c, d, h, w = x_ncdhw.shape
    x_cn = jnp.transpose(x_ncdhw, (1, 0, 2, 3, 4)).astype(dtype)  # (Cin,N,D,H,W)
    xp = jnp.pad(x_cn, ((0, 0), (0, 0), (pad, pad), (pad, pad), (pad, pad)))
    cols = []
    for kd in range(k):
        for kh in range(k):
            for kw in range(k):
                cols.append(xp[:, :, kd:kd + d, kh:kh + h, kw:kw + w])
    pt = jnp.stack(cols, axis=0)                 # (k^3, Cin, N, D, H, W)
    # feature index f = ((kd*k+kh)*k+kw)*Cin + ci ; column m = ((n*D+d)*H+h)*W+w
    return pt.reshape(k * k * k * c, n * d * h * w)


def conv3d_block_forward(x_ncdhw, weight_oidhw, bias, gamma, beta,
                         kernel_size, *, tile_m=1024):
    """Conv3DBlock forward. x: (N, Cin, D, H, W) -> (N, Cout, D, H, W)."""
    n, cin, d, h, w = x_ncdhw.shape
    cout = weight_oidhw.shape[0]
    k = kernel_size
    pad = (k - 1) // 2

    kfeat = k * k * k * cin
    kpad = ((kfeat + 127) // 128) * 128          # contraction dim padded to 128

    assert tile_m % 128 == 0, "tile_m must be a multiple of 128 (lane dim)"
    m = n * d * h * w
    num_tiles = -(-m // tile_m)
    m_pad = num_tiles * tile_m

    # VMEM budget (double-buffered input/output tiles) must stay well under the
    # 32 MiB scoped limit so the same tiling is safe on v5e/v6e/v7x.
    vmem_bytes = (2 * kpad * tile_m * 2 + 2 * cout * tile_m * 4
                  + cout * kpad * 2 + 8 * cout * 4)
    assert vmem_bytes < 24 * 1024 * 1024, "tile_m too large for VMEM budget"

    # bf16 GEMM operands; zero-pad K (features) and M (rows) dims.
    patches_t = _im2col_transposed(x_ncdhw, k, pad, jnp.bfloat16)   # (kfeat, m)
    patches_t = jnp.pad(patches_t, ((0, kpad - kfeat), (0, m_pad - m)))

    w_t = jnp.transpose(weight_oidhw, (0, 2, 3, 4, 1)).reshape(cout, kfeat)
    w_t = jnp.pad(w_t, ((0, 0), (0, kpad - kfeat))).astype(jnp.bfloat16)

    b2 = bias.reshape(cout, 1).astype(jnp.float32)
    g2 = gamma.reshape(cout, 1).astype(jnp.float32)
    bt2 = beta.reshape(cout, 1).astype(jnp.float32)

    # ---------------- pass 1: conv GEMM + per-channel stats -----------------
    p1_bytes = (kpad * m_pad * 2 + cout * kpad * 2 + cout * 4
                + cout * m_pad * 4 + 2 * cout * 4)
    conv_out, ch_sum, ch_sq = pl.pallas_call(
        functools.partial(_conv_stats_kernel, tile_m=tile_m, m_true=m),
        out_shape=(
            jax.ShapeDtypeStruct((cout, m_pad), jnp.float32),
            jax.ShapeDtypeStruct((cout, 1), jnp.float32),
            jax.ShapeDtypeStruct((cout, 1), jnp.float32),
        ),
        grid_spec=pltpu.PrefetchScalarGridSpec(
            num_scalar_prefetch=0,
            grid=(num_tiles,),
            in_specs=[
                pl.BlockSpec((cout, kpad), lambda i: (0, 0)),
                pl.BlockSpec((cout, 1), lambda i: (0, 0)),
                pl.BlockSpec((kpad, tile_m), lambda i: (0, i)),
            ],
            out_specs=(
                pl.BlockSpec((cout, tile_m), lambda i: (0, i)),
                pl.BlockSpec((cout, 1), lambda i: (0, 0)),
                pl.BlockSpec((cout, 1), lambda i: (0, 0)),
            ),
        ),
        compiler_params=pltpu.CompilerParams(
            dimension_semantics=("arbitrary",),   # revisited stats accumulators
            vmem_limit_bytes=32 * 1024 * 1024,
        ),
        cost_estimate=pl.CostEstimate(
            flops=2 * m_pad * kpad * cout,
            transcendentals=0,
            bytes_accessed=p1_bytes),
    )(w_t, b2, patches_t)

    # ---------------- pass 2: normalize (scale/shift) + ReLU -----------------
    p2_bytes = 2 * cout * m_pad * 4 + 4 * cout * 4
    out_t = pl.pallas_call(
        functools.partial(_bn_relu_kernel, m_true=m),
        out_shape=jax.ShapeDtypeStruct((cout, m_pad), jnp.float32),
        grid_spec=pltpu.PrefetchScalarGridSpec(
            num_scalar_prefetch=0,
            grid=(num_tiles,),
            in_specs=[
                pl.BlockSpec((cout, tile_m), lambda i: (0, i)),
                pl.BlockSpec((cout, 1), lambda i: (0, 0)),
                pl.BlockSpec((cout, 1), lambda i: (0, 0)),
                pl.BlockSpec((cout, 1), lambda i: (0, 0)),
                pl.BlockSpec((cout, 1), lambda i: (0, 0)),
            ],
            out_specs=pl.BlockSpec((cout, tile_m), lambda i: (0, i)),
        ),
        compiler_params=pltpu.CompilerParams(
            dimension_semantics=("parallel",),
            vmem_limit_bytes=32 * 1024 * 1024,
        ),
        cost_estimate=pl.CostEstimate(
            flops=3 * m_pad * cout,
            transcendentals=cout * num_tiles,
            bytes_accessed=p2_bytes),
    )(conv_out, ch_sum, ch_sq, g2, bt2)

    # (Cout, M) -> (Cout, N, D, H, W) -> NCDHW
    out = out_t[:, :m].reshape(cout, n, d, h, w)
    return jnp.transpose(out, (1, 0, 2, 3, 4))


# ----------------------------------------------------------------------------
# Pure-JAX reference (f32 conv + BN(training batch stats) + ReLU).
# ----------------------------------------------------------------------------
def reference_forward(x_ncdhw, weight, bias, gamma, beta, kernel_size):
    pad = (kernel_size - 1) // 2
    y = lax.conv_general_dilated(
        x_ncdhw, weight, window_strides=(1, 1, 1),
        padding=[(pad, pad)] * 3,
        dimension_numbers=("NCDHW", "OIDHW", "NCDHW"),
        precision=lax.Precision.HIGHEST)
    y = y + bias.reshape(1, -1, 1, 1, 1)
    mean = jnp.mean(y, axis=(0, 2, 3, 4), keepdims=True)
    var = jnp.mean((y - mean) ** 2, axis=(0, 2, 3, 4), keepdims=True)
    y = (y - mean) * lax.rsqrt(var + BN_EPS)
    y = y * gamma.reshape(1, -1, 1, 1, 1) + beta.reshape(1, -1, 1, 1, 1)
    return jnp.maximum(y, 0.0)


if __name__ == "__main__":
    # Small shapes consistent with the module: in_planes=4, out_planes=8, k=3.
    N, CIN, COUT, D, H, W, K = 2, 4, 8, 8, 8, 8, 3

    key = jax.random.PRNGKey(0)
    kx, kw, kb = jax.random.split(key, 3)

    x = jax.random.normal(kx, (N, CIN, D, H, W), dtype=jnp.float32)

    # Deterministic synthetic parameters (PyTorch Conv3d weight layout OIDHW).
    fan_in = CIN * K * K * K
    bound = 1.0 / math.sqrt(fan_in)
    weight = jax.random.uniform(kw, (COUT, CIN, K, K, K), jnp.float32, -bound, bound)
    bias = jax.random.uniform(kb, (COUT,), jnp.float32, -bound, bound)
    gamma = jnp.ones((COUT,), jnp.float32)    # BatchNorm3d affine init
    beta = jnp.zeros((COUT,), jnp.float32)

    # tile_m=256 -> 4 grid steps on the toy shape: exercises the tiled GEMM and
    # the cross-tile stats accumulation (default tile_m=1024 for real shapes).
    fwd = jax.jit(functools.partial(conv3d_block_forward,
                                    kernel_size=K, tile_m=256))
    out = jax.block_until_ready(fwd(x, weight, bias, gamma, beta))
    assert out.shape == (N, COUT, D, H, W), out.shape

    # Loose check vs the true-f32 reference (kernel GEMM operands are bf16).
    ref_f32 = jax.block_until_ready(
        reference_forward(x, weight, bias, gamma, beta, K))
    if not jnp.allclose(out, ref_f32, atol=5e-2, rtol=5e-2):
        raise AssertionError("Pallas Conv3DBlock mismatch vs f32 reference")

    # Tight check vs the same math with bf16-rounded conv operands.
    xb = x.astype(jnp.bfloat16).astype(jnp.float32)
    wb = weight.astype(jnp.bfloat16).astype(jnp.float32)
    ref_bf = jax.block_until_ready(
        reference_forward(xb, wb, bias, gamma, beta, K))
    if not jnp.allclose(out, ref_bf, atol=5e-3, rtol=5e-3):
        raise AssertionError("Pallas Conv3DBlock mismatch vs bf16-rounded reference")

    print("KERNEL_OK")
</pallas_src>

<mosaic_0001>
module attributes {stable_mosaic.version = 11 : i64} {
  func.func @_bn_relu_kernel(%arg0: i32, %arg1: memref<8x256xf32, #tpu.memory_space<vmem>>, %arg2: memref<8x1xf32, #tpu.memory_space<vmem>>, %arg3: memref<8x1xf32, #tpu.memory_space<vmem>>, %arg4: memref<8x1xf32, #tpu.memory_space<vmem>>, %arg5: memref<8x1xf32, #tpu.memory_space<vmem>>, %arg6: memref<8x256xf32, #tpu.memory_space<vmem>>) attributes {dimension_semantics = [#tpu.dimension_semantics<parallel>], iteration_bounds = array<i64: 4>, scalar_prefetch = 0 : i64, scratch_operands = 0 : i64, tpu.core_type = #tpu.core_type<tc>, window_params = [{transform_indices = @transform_0, window_bounds = array<i64: 8, 256>}, {pipeline_mode = #tpu.pipeline_mode<synchronous>, transform_indices = @transform_1, window_bounds = array<i64: 8, 1>}, {pipeline_mode = #tpu.pipeline_mode<synchronous>, transform_indices = @transform_2, window_bounds = array<i64: 8, 1>}, {pipeline_mode = #tpu.pipeline_mode<synchronous>, transform_indices = @transform_3, window_bounds = array<i64: 8, 1>}, {pipeline_mode = #tpu.pipeline_mode<synchronous>, transform_indices = @transform_4, window_bounds = array<i64: 8, 1>}, {transform_indices = @transform_5, window_bounds = array<i64: 8, 256>}]} {
    %c0 = arith.constant 0 : index
    %c0_0 = arith.constant 0 : index
    %0 = vector.load %arg2[%c0, %c0_0] : memref<8x1xf32, #tpu.memory_space<vmem>>, vector<8x1xf32>
    %cst = arith.constant 9.765625E-4 : f32
    %1 = vector.broadcast %cst : f32 to vector<8x1xf32>
    %2 = arith.mulf %0, %1 : vector<8x1xf32>
    %c0_1 = arith.constant 0 : index
    %c0_2 = arith.constant 0 : index
    %3 = vector.load %arg3[%c0_1, %c0_2] : memref<8x1xf32, #tpu.memory_space<vmem>>, vector<8x1xf32>
    %cst_3 = arith.constant 9.765625E-4 : f32
    %4 = vector.broadcast %cst_3 : f32 to vector<8x1xf32>
    %5 = arith.mulf %3, %4 : vector<8x1xf32>
    %6 = arith.mulf %2, %2 : vector<8x1xf32>
    %7 = arith.subf %5, %6 : vector<8x1xf32>
    %c0_4 = arith.constant 0 : index
    %c0_5 = arith.constant 0 : index
    %8 = vector.load %arg4[%c0_4, %c0_5] : memref<8x1xf32, #tpu.memory_space<vmem>>, vector<8x1xf32>
    %cst_6 = arith.constant 9.99999974E-6 : f32
    %9 = vector.broadcast %cst_6 : f32 to vector<8x1xf32>
    %10 = arith.addf %7, %9 : vector<8x1xf32>
    %11 = math.rsqrt %10 : vector<8x1xf32>
    %12 = arith.mulf %8, %11 : vector<8x1xf32>
    %c0_7 = arith.constant 0 : index
    %c0_8 = arith.constant 0 : index
    %13 = vector.load %arg5[%c0_7, %c0_8] : memref<8x1xf32, #tpu.memory_space<vmem>>, vector<8x1xf32>
    %14 = arith.mulf %2, %12 : vector<8x1xf32>
    %15 = arith.subf %13, %14 : vector<8x1xf32>
    %c0_9 = arith.constant 0 : index
    %c0_10 = arith.constant 0 : index
    %16 = vector.load %arg1[%c0_9, %c0_10] : memref<8x256xf32, #tpu.memory_space<vmem>>, vector<8x256xf32>
    %17 = vector.broadcast %12 : vector<8x1xf32> to vector<8x256xf32>
    %18 = arith.mulf %16, %17 : vector<8x256xf32>
    %19 = vector.broadcast %15 : vector<8x1xf32> to vector<8x256xf32>
    %20 = arith.addf %18, %19 : vector<8x256xf32>
    %cst_11 = arith.constant 0.000000e+00 : f32
    %21 = vector.broadcast %cst_11 : f32 to vector<8x256xf32>
    %22 = arith.maximumf %20, %21 : vector<8x256xf32>
    %c0_12 = arith.constant 0 : index
    %c0_13 = arith.constant 0 : index
    %23 = vector.load %arg6[%c0_12, %c0_13] : memref<8x256xf32, #tpu.memory_space<vmem>>, vector<8x256xf32>
    tpu.vector_store %arg6[%c0_12, %c0_13], %22 {strides = array<i32>} : memref<8x256xf32, #tpu.memory_space<vmem>>, vector<8x256xf32>,
    return
  }
  func.func @transform_0(%arg0: i32) -> (i32, i32) {
    %c0_i32 = arith.constant 0 : i32
    %c0_i32_0 = arith.constant 0 : i32
    return %c0_i32, %arg0 : i32, i32
  }
  func.func @transform_1(%arg0: i32) -> (i32, i32) {
    %c0_i32 = arith.constant 0 : i32
    %c0_i32_0 = arith.constant 0 : i32
    %c0_i32_1 = arith.constant 0 : i32
    return %c0_i32, %c0_i32_0 : i32, i32
  }
  func.func @transform_2(%arg0: i32) -> (i32, i32) {
    %c0_i32 = arith.constant 0 : i32
    %c0_i32_0 = arith.constant 0 : i32
    %c0_i32_1 = arith.constant 0 : i32
    return %c0_i32, %c0_i32_0 : i32, i32
  }
  func.func @transform_3(%arg0: i32) -> (i32, i32) {
    %c0_i32 = arith.constant 0 : i32
    %c0_i32_0 = arith.constant 0 : i32
    %c0_i32_1 = arith.constant 0 : i32
    return %c0_i32, %c0_i32_0 : i32, i32
  }
  func.func @transform_4(%arg0: i32) -> (i32, i32) {
    %c0_i32 = arith.constant 0 : i32
    %c0_i32_0 = arith.constant 0 : i32
    %c0_i32_1 = arith.constant 0 : i32
    return %c0_i32, %c0_i32_0 : i32, i32
  }
  func.func @transform_5(%arg0: i32) -> (i32, i32) {
    %c0_i32 = arith.constant 0 : i32
    %c0_i32_0 = arith.constant 0 : i32
    return %c0_i32, %arg0 : i32, i32
  }
}

module attributes {stable_mosaic.version = 11 : i64} {
  func.func @_conv_stats_kernel(%arg0: i32, %arg1: memref<8x128xbf16, #tpu.memory_space<vmem>>, %arg2: memref<8x1xf32, #tpu.memory_space<vmem>>, %arg3: memref<128x256xbf16, #tpu.memory_space<vmem>>, %arg4: memref<8x256xf32, #tpu.memory_space<vmem>>, %arg5: memref<8x1xf32, #tpu.memory_space<vmem>>, %arg6: memref<8x1xf32, #tpu.memory_space<vmem>>) attributes {dimension_semantics = [#tpu.dimension_semantics<arbitrary>], iteration_bounds = array<i64: 4>, scalar_prefetch = 0 : i64, scratch_operands = 0 : i64, tpu.core_type = #tpu.core_type<tc>, window_params = [{pipeline_mode = #tpu.pipeline_mode<synchronous>, transform_indices = @transform_0, window_bounds = array<i64: 8, 128>}, {pipeline_mode = #tpu.pipeline_mode<synchronous>, transform_indices = @transform_1, window_bounds = array<i64: 8, 1>}, {transform_indices = @transform_2, window_bounds = array<i64: 128, 256>}, {transform_indices = @transform_3, window_bounds = array<i64: 8, 256>}, {pipeline_mode = #tpu.pipeline_mode<synchronous>, transform_indices = @transform_4, window_bounds = array<i64: 8, 1>}, {pipeline_mode = #tpu.pipeline_mode<synchronous>, transform_indices = @transform_5, window_bounds = array<i64: 8, 1>}]} {
    %c0 = arith.constant 0 : index
    %c0_0 = arith.constant 0 : index
    %0 = vector.load %arg1[%c0, %c0_0] : memref<8x128xbf16, #tpu.memory_space<vmem>>, vector<8x128xbf16>
    %c0_1 = arith.constant 0 : index
    %c0_2 = arith.constant 0 : index
    %1 = vector.load %arg3[%c0_1, %c0_2] : memref<128x256xbf16, #tpu.memory_space<vmem>>, vector<128x256xbf16>
    %cst = arith.constant dense<0.000000e+00> : vector<8x256xf32>
    %2 = tpu.matmul %0, %1, %cst {dimension_numbers = #tpu.dot_dimension_numbers<[1], [0], [0], [1], [0, 0, 1, 1], [], []>} : vector<8x128xbf16>, vector<128x256xbf16>, vector<8x256xf32> -> vector<8x256xf32>
    %c0_3 = arith.constant 0 : index
    %c0_4 = arith.constant 0 : index
    %3 = vector.load %arg2[%c0_3, %c0_4] : memref<8x1xf32, #tpu.memory_space<vmem>>, vector<8x1xf32>
    %4 = vector.broadcast %3 : vector<8x1xf32> to vector<8x256xf32>
    %5 = arith.addf %2, %4 : vector<8x256xf32>
    %c0_5 = arith.constant 0 : index
    %c0_6 = arith.constant 0 : index
    %6 = vector.load %arg4[%c0_5, %c0_6] : memref<8x256xf32, #tpu.memory_space<vmem>>, vector<8x256xf32>
    tpu.vector_store %arg4[%c0_5, %c0_6], %5 {strides = array<i32>} : memref<8x256xf32, #tpu.memory_space<vmem>>, vector<8x256xf32>,
    %c256_i32 = arith.constant 256 : i32
    %7 = arith.muli %arg0, %c256_i32 : i32
    %8 = tpu.iota {dimensions = array<i32: 1>} : vector<8x256xi32>
    %9 = vector.broadcast %7 : i32 to vector<8x256xi32>
    %10 = arith.addi %9, %8 : vector<8x256xi32>
    %c1024_i32 = arith.constant 1024 : i32
    %11 = vector.broadcast %c1024_i32 : i32 to vector<8x256xi32>
    %12 = arith.cmpi slt, %10, %11 : vector<8x256xi32>
    %cst_7 = arith.constant 0.000000e+00 : f32
    %13 = vector.broadcast %cst_7 : f32 to vector<8x256xf32>
    %14 = arith.select %12, %5, %13 : vector<8x256xi1>, vector<8x256xf32>
    %c0_i32 = arith.constant 0 : i32
    %15 = arith.cmpi eq, %arg0, %c0_i32 : i32
    %16 = arith.extui %15 : i1 to i32
    %c0_i32_8 = arith.constant 0 : i32
    %17 = arith.cmpi ne, %16, %c0_i32_8 : i32
    scf.if %17 {
      %cst_19 = arith.constant 0.000000e+00 : f32
      %29 = vector.broadcast %cst_19 : f32 to vector<8x1xf32>
      %c0_20 = arith.constant 0 : index
      %c0_21 = arith.constant 0 : index
      %30 = vector.load %arg5[%c0_20, %c0_21] : memref<8x1xf32, #tpu.memory_space<vmem>>, vector<8x1xf32>
      tpu.vector_store %arg5[%c0_20, %c0_21], %29 {strides = array<i32>} : memref<8x1xf32, #tpu.memory_space<vmem>>, vector<8x1xf32>,
      %cst_22 = arith.constant 0.000000e+00 : f32
      %31 = vector.broadcast %cst_22 : f32 to vector<8x1xf32>
      %c0_23 = arith.constant 0 : index
      %c0_24 = arith.constant 0 : index
      %32 = vector.load %arg6[%c0_23, %c0_24] : memref<8x1xf32, #tpu.memory_space<vmem>>, vector<8x1xf32>
      tpu.vector_store %arg6[%c0_23, %c0_24], %31 {strides = array<i32>} : memref<8x1xf32, #tpu.memory_space<vmem>>, vector<8x1xf32>,
    } else {
    }
    %c0_9 = arith.constant 0 : index
    %c0_10 = arith.constant 0 : index
    %18 = vector.load %arg5[%c0_9, %c0_10] : memref<8x1xf32, #tpu.memory_space<vmem>>, vector<8x1xf32>
    %cst_11 = arith.constant dense<0.000000e+00> : vector<8xf32>
    %19 = vector.multi_reduction <add>, %14, %cst_11 [1] : vector<8x256xf32> to vector<8xf32>
    %20 = vector.shape_cast %19 : vector<8xf32> to vector<8x1xf32>
    %21 = arith.addf %18, %20 : vector<8x1xf32>
    %c0_12 = arith.constant 0 : index
    %c0_13 = arith.constant 0 : index
    %22 = vector.load %arg5[%c0_12, %c0_13] : memref<8x1xf32, #tpu.memory_space<vmem>>, vector<8x1xf32>
    tpu.vector_store %arg5[%c0_12, %c0_13], %21 {strides = array<i32>} : memref<8x1xf32, #tpu.memory_space<vmem>>, vector<8x1xf32>,
    %c0_14 = arith.constant 0 : index
    %c0_15 = arith.constant 0 : index
    %23 = vector.load %arg6[%c0_14, %c0_15] : memref<8x1xf32, #tpu.memory_space<vmem>>, vector<8x1xf32>
    %24 = arith.mulf %14, %14 : vector<8x256xf32>
    %cst_16 = arith.constant dense<0.000000e+00> : vector<8xf32>
    %25 = vector.multi_reduction <add>, %24, %cst_16 [1] : vector<8x256xf32> to vector<8xf32>
    %26 = vector.shape_cast %25 : vector<8xf32> to vector<8x1xf32>
    %27 = arith.addf %23, %26 : vector<8x1xf32>
    %c0_17 = arith.constant 0 : index
    %c0_18 = arith.constant 0 : index
    %28 = vector.load %arg6[%c0_17, %c0_18] : memref<8x1xf32, #tpu.memory_space<vmem>>, vector<8x1xf32>
    tpu.vector_store %arg6[%c0_17, %c0_18], %27 {strides = array<i32>} : memref<8x1xf32, #tpu.memory_space<vmem>>, vector<8x1xf32>,
    return
  }
  func.func @transform_0(%arg0: i32) -> (i32, i32) {
    %c0_i32 = arith.constant 0 : i32
    %c0_i32_0 = arith.constant 0 : i32
    %c0_i32_1 = arith.constant 0 : i32
    return %c0_i32, %c0_i32_0 : i32, i32
  }
  func.func @transform_1(%arg0: i32) -> (i32, i32) {
    %c0_i32 = arith.constant 0 : i32
    %c0_i32_0 = arith.constant 0 : i32
    %c0_i32_1 = arith.constant 0 : i32
    return %c0_i32, %c0_i32_0 : i32, i32
  }
  func.func @transform_2(%arg0: i32) -> (i32, i32) {
    %c0_i32 = arith.constant 0 : i32
    %c0_i32_0 = arith.constant 0 : i32
    return %c0_i32, %arg0 : i32, i32
  }
  func.func @transform_3(%arg0: i32) -> (i32, i32) {
    %c0_i32 = arith.constant 0 : i32
    %c0_i32_0 = arith.constant 0 : i32
    return %c0_i32, %arg0 : i32, i32
  }
  func.func @transform_4(%arg0: i32) -> (i32, i32) {
    %c0_i32 = arith.constant 0 : i32
    %c0_i32_0 = arith.constant 0 : i32
    %c0_i32_1 = arith.constant 0 : i32
    return %c0_i32, %c0_i32_0 : i32, i32
  }
  func.func @transform_5(%arg0: i32) -> (i32, i32) {
    %c0_i32 = arith.constant 0 : i32
    %c0_i32_0 = arith.constant 0 : i32
    %c0_i32_1 = arith.constant 0 : i32
    return %c0_i32, %c0_i32_0 : i32, i32
  }
}

</mosaic_0001>

<bundles_post_ra>
// kernel: conv3d_block_forward.3
= control target key start
LH: loop header
LB: loop body
LE: loop exit
PB: predicated region body
PF: predicated region fallthrough
CT: control target
= control target key end

     0   :  { %s379_s18 = smov 0   ;;  %s408_s0 = inlined_call_operand.vmem [shape: f32[8,1024], index: 0, kind: input, shape index: {}]   ;;  %s409_s1 = inlined_call_operand.vmem [shape: f32[8,1], index: 1, kind: input, shape index: {}]   ;;  %s410_s2 = inlined_call_operand.vmem [shape: f32[8,1], index: 2, kind: input, shape index: {}]   ;;  %s411_s3 = inlined_call_operand.vmem [shape: f32[8,1], index: 3, kind: input, shape index: {}]   ;;  %s412_s4 = inlined_call_operand.vmem [shape: f32[8,1], index: 4, kind: input, shape index: {}]   ;;  %s413_s5 = inlined_call_operand.vmem [shape: f32[8,1024], index: 5, kind: output, shape index: {}]  }
   0x1 LB: > { %s317_s19 = sadd.s32 4294967295, %s346_s18   ;;  %p321_p0 = scmp.ge.s32.totalorder %s346_s18, 1  ;;  %s346_s18 = sphi %s379_s18, %s15_s18  }
   0x2   : > { %p188_p1 = scmp.lt.s32.totalorder %s346_s18, 5 }
   0x4   : > { %p189_p2 = pnand %p321_p0, %p188_p1 }
   0x5   : > { %v228_v0 = vld [vmem:[%s409_s1] sm:$0xff] (!%p189_p2)  ;;  %v348_v2 = vmov (!%p189_p2), 0   ;;  %s322_s28 = sshll.u32 (!%p189_p2), %s317_s19, 1 }
   0x6   : > { %192 = sbr.rel (%p189_p2) target bundleno = 164 (0xa4), region = 40  ;;  %v230_v1 = vld [vmem:[%s410_s2] sm:$0xff] (!%p189_p2)  ;;  %337 = vset.pattern.permute.xlu0 (!%p189_p2), %v348_v2  ;;  %v229_v3 = vmul.f32 (!%p189_p2), 0.0009765625, %v228_v0  ;;  %p217_p3 = scmp.lt.s32.totalorder (!%p189_p2), %s322_s28, 7 }
   0x7   : > { %v231_v4 = vmul.f32 (!%p189_p2), 0.0009765625, %v230_v1  ;;  %v234_v8 = vld [vmem:[%s411_s3] sm:$0xff] (!%p189_p2) }
   0x8   : > { %v232_v5 = vmul.f32 (!%p189_p2), %v229_v3, %v229_v3  ;;  %v238_v11 = vld [vmem:[%s412_s4] sm:$0xff] (!%p189_p2) }
   0xa   : > { %v233_v6 = vsub.f32 (!%p189_p2), %v231_v4, %v232_v5 }
   0xc   : > { %v235_v7 = vadd.f32 (!%p189_p2), 1e-05, %v233_v6 }
   0xd   : > { %s415_s28 = smov (!%p217_p3, %s322_s28), 7 }
   0xe   : > { %338 = vrsqrt.f32 %v235_v7  ;;  %s323_s29 = sshll.u32 %s415_s28, 3 }
   0xf   : > { %s220_s7 = scalar_lea.vmem %s408_s0, %s323_s29  ;;  %s226_s10 = scalar_lea.vmem %s413_s5, %s323_s29 }
  0x10   : > { %v241_v15 = vld [vmem:[%s220_s7] sm:$0xff]  ;;  %v242_v16 = vld [vmem:[%s220_s7 + $0x8] sm:$0xff] }
  0x18   : > { %v339_v9 = vpop.eup %338 }
  0x19   : > { %v237_v10 = vmul.f32 %v339_v9, %v234_v8 }
  0x1b   : > { %245 = vperm.xlu0 %337, %v237_v10   ;;  %v239_v12 = vmul.f32 %v237_v10, %v229_v3 }
  0x1d   : > { %v240_v13 = vsub.f32 %v238_v11, %v239_v12 }
  0x1f   : > { %252 = vperm.xlu0 %337, %v240_v13  }
  0x9a   : > { %v246_v14 = vpop.permute.xlu0 %245 }
  0x9b   : > { %v248_v17 = vmul.f32 %v246_v14, %v241_v15  ;;  %v249_v18 = vmul.f32 %v246_v14, %v242_v16 }
  0x9e   : > { %v253_v19 = vpop.permute.xlu0 %252 }
  0x9f   : > { %v255_v20 = vadd.f32 %v253_v19, %v248_v17  ;;  %v256_v21 = vadd.f32 %v253_v19, %v249_v18 }
  0xa1   : > { %v257_v22 = vmax.f32 %v255_v20, 0.0  ;;  %v258_v23 = vmax.f32 %v256_v21, 0.0 }
  0xa3   : > { %259 = vst [vmem:[%s226_s10] sm:$0xff] %v257_v22  ;;  %260 = vst [vmem:[%s226_s10 + $0x8] sm:$0xff] %v258_v23 }
  0xa4 PF: > { %s15_s18 = sadd.s32 1, %s346_s18  }
  0xa5   : > { %p12_p4 = scmp.ge.s32.totalorder %s15_s18, 6  }
  0xa7   :  { %14 = sbr.rel (!%p12_p4) target bundleno = 1 (0x1), region = 70 }

// kernel: conv3d_block_forward.2
= control target key start
LH: loop header
LB: loop body
LE: loop exit
PB: predicated region body
PF: predicated region fallthrough
CT: control target
= control target key end

     0   :  { %s710_s18 = smov 0   ;;  %s712_s19 = smov 0   ;;  %s807_s0 = inlined_call_operand.vmem [shape: bf16[8,128], index: 0, kind: input, shape index: {}]   ;;  %s808_s1 = inlined_call_operand.vmem [shape: f32[8,1], index: 1, kind: input, shape index: {}]   ;;  %s809_s2 = inlined_call_operand.vmem [shape: bf16[128,1024], index: 2, kind: input, shape index: {}]   ;;  %s810_s3 = inlined_call_operand.vmem [shape: f32[8,1024], index: 3, kind: output, shape index: {0}]   ;;  %s811_s4 = inlined_call_operand.vmem [shape: f32[8,1], index: 4, kind: output, shape index: {1}]   ;;  %s812_s5 = inlined_call_operand.vmem [shape: f32[8,1], index: 5, kind: output, shape index: {2}]  }
   0x1   :  { %s714_s20 = smov 0  }
   0x2 LB: > { %s726_s21 = sadd.s32 4294967295, %s676_s20   ;;  %s729_s22 = sadd.s32 1, %s676_s20   ;;  %s676_s20 = sphi %s714_s20, %s815_s20   ;;  %s672_s19 = sphi %s712_s19, %s814_s19   ;;  %s668_s18 = sphi %s710_s18, %s813_s18  }
   0x3   : > { %s62_s23 = ssub.s32 %s676_s20, %s729_s22  ;;  %s65_s24 = sadd.s32 1, %s672_s19 }
   0x4   : > { %p63_p0 = scmp.eq.s32.totalorder %s62_s23, 0  ;;  %p72_p1 = scmp.ne.s32.totalorder %s672_s19, %s668_s18 }
   0x5   : > { %p73_p2 = scmp.eq.s32.totalorder %s676_s20, 0  ;;  %p574_p4 = scmp.ge.s32.totalorder %s676_s20, 4 }
   0x6   : > { %s738_s25 = scalar_select %p63_p0, %s672_s19, %s65_s24  }
   0x7   : > { %p74_p3 = por %p73_p2, %p72_p1  ;;  %172 = sbr.rel (%p574_p4) target bundleno = 34 (0x22), region = 24 }
   0xe   : > { %175 = sbr.rel (!%p74_p3) target bundleno = 34 (0x22), region = 28  ;;  %s177_s26 = sand.u32 (%p74_p3), 1, %s672_s19  }
   0xf   : > { %s602_s27 = sshll.u32 (%p74_p3), %s676_s20, 3  ;;  %s575_s28 = sshll.u32 (%p74_p3), %s177_s26, 7 }
  0x10   : > { %s746_s6 = scalar_lea.vmem (%p74_p3), %s809_s2, %s602_s27  ;;  %s179_s7 = scalar_lea.vmem (%p74_p3), [#allocation2], %s575_s28 }
  0x11   : > { %v240_v0 = vld [vmem:[%s746_s6] sm:$0xff] (%p74_p3) }
  0x12   : > { %v242_v1 = vld [vmem:[%s746_s6 + $0x20] sm:$0xff] (%p74_p3)  ;;  %241 = vst [vmem:[%s179_s7] sm:$0xff] (%p74_p3), %v240_v0 }
  0x13   : > { %v244_v2 = vld [vmem:[%s746_s6 + $0x40] sm:$0xff] (%p74_p3)  ;;  %243 = vst [vmem:[%s179_s7 + $0x8] sm:$0xff] (%p74_p3), %v242_v1 }
  0x14   : > { %245 = vst [vmem:[%s179_s7 + $0x10] sm:$0xff] (%p74_p3), %v244_v2  ;;  %v246_v3 = vld [vmem:[%s746_s6 + $0x60] sm:$0xff] (%p74_p3) }
  0x15   : > { %v248_v4 = vld [vmem:[%s746_s6 + $0x80] sm:$0xff]  ;;  %247 = vst [vmem:[%s179_s7 + $0x18] sm:$0xff] %v246_v3 }
  0x16   : > { %v250_v5 = vld [vmem:[%s746_s6 + $0xa0] sm:$0xff]  ;;  %249 = vst [vmem:[%s179_s7 + $0x20] sm:$0xff] %v248_v4 }
  0x17   : > { %251 = vst [vmem:[%s179_s7 + $0x28] sm:$0xff] %v250_v5  ;;  %v252_v6 = vld [vmem:[%s746_s6 + $0xc0] sm:$0xff] }
  0x18   : > { %v254_v7 = vld [vmem:[%s746_s6 + $0xe0] sm:$0xff]  ;;  %253 = vst [vmem:[%s179_s7 + $0x30] sm:$0xff] %v252_v6 }
  0x19   : > { %v256_v8 = vld [vmem:[%s746_s6 + $0x100] sm:$0xff]  ;;  %255 = vst [vmem:[%s179_s7 + $0x38] sm:$0xff] %v254_v7 }
  0x1a   : > { %257 = vst [vmem:[%s179_s7 + $0x40] sm:$0xff] %v256_v8  ;;  %v258_v9 = vld [vmem:[%s746_s6 + $0x120] sm:$0xff] }
  0x1b   : > { %v260_v10 = vld [vmem:[%s746_s6 + $0x140] sm:$0xff]  ;;  %259 = vst [vmem:[%s179_s7 + $0x48] sm:$0xff] %v258_v9 }
  0x1c   : > { %v262_v11 = vld [vmem:[%s746_s6 + $0x160] sm:$0xff]  ;;  %261 = vst [vmem:[%s179_s7 + $0x50] sm:$0xff] %v260_v10 }
  0x1d   : > { %263 = vst [vmem:[%s179_s7 + $0x58] sm:$0xff] %v262_v11  ;;  %v264_v12 = vld [vmem:[%s746_s6 + $0x180] sm:$0xff] }
  0x1e   : > { %v266_v13 = vld [vmem:[%s746_s6 + $0x1a0] sm:$0xff]  ;;  %265 = vst [vmem:[%s179_s7 + $0x60] sm:$0xff] %v264_v12 }
  0x1f   : > { %v268_v14 = vld [vmem:[%s746_s6 + $0x1c0] sm:$0xff]  ;;  %267 = vst [vmem:[%s179_s7 + $0x68] sm:$0xff] %v266_v13 }
  0x20   : > { %269 = vst [vmem:[%s179_s7 + $0x70] sm:$0xff] %v268_v14  ;;  %v270_v15 = vld [vmem:[%s746_s6 + $0x1e0] sm:$0xff] }
  0x21   : > { %271 = vst [vmem:[%s179_s7 + $0x78] sm:$0xff] %v270_v15 }
  0x22 PF: > { %p578_p5 = scmp.ge.s32.totalorder %s676_s20, 1  ;;  %p276_p6 = scmp.lt.s32.totalorder %s676_s20, 5 }
  0x24   : > { %p277_p7 = pnand %p578_p5, %p276_p6 }
  0x25   : > { %s283_s8 = sand.u32 (!%p277_p7), 1, %s668_s18   ;;  %v335_v16 = vld [vmem:[%s808_s1] sm:$0xff] (!%p277_p7)  ;;  %v678_v17 = vmov (!%p277_p7), 0   ;;  %v465_v35 = vlaneseq (!%p277_p7)  ;;  %s580_s15 = sshll.u32 (!%p277_p7), %s726_s21, 1 }
  0x26   : > { %280 = sbr.rel (%p277_p7) target bundleno = 440 (0x1b8), region = 66  ;;  %s579_s11 = sshll.u32 (!%p277_p7), %s283_s8, 7  ;;  %453 = vmatprep.mubr.bf16.mxu0 (!%p277_p7), %v678_v17  ;;  %629 = vset.pattern.permute.xlu0 (!%p277_p7), %v678_v17  ;;  %v318_v34 = vld [vmem:[%s807_s0] sm:$0xf] (!%p277_p7) }
  0x27   : > { %338 = vperm.xlu0 (!%p277_p7), %629, %v335_v16   ;;  %s285_s12 = scalar_lea.vmem (!%p277_p7), [#allocation2], %s579_s11  ;;  %p312_p8 = scmp.lt.s32.totalorder (!%p277_p7), %s580_s15, 7  ;;  %v466_v36 = vand.u32 (!%p277_p7), 127, %v465_v35 }
  0x28   : > { %v630_v18 = vld [vmem:[%s285_s12 + $0x4] ss:$8 sps:$4 sm:$0xff] (!%p277_p7)   ;;  %v632_v19 = vld [vmem:[%s285_s12] ss:$8 sps:$4 sm:$0xff] (!%p277_p7)   ;;  %v633_v20 = vld [vmem:[%s285_s12 + $0x14] ss:$8 sps:$4 sm:$0xff] (!%p277_p7)  }
  0x29   : > { %421 = vmatprep.subr.bf16.mxu0 (!%p277_p7), %v630_v18  ;;  %v635_v21 = vld [vmem:[%s285_s12 + $0x10] ss:$8 sps:$4 sm:$0xff] (!%p277_p7)   ;;  %v636_v22 = vld [vmem:[%s285_s12 + $0x24] ss:$8 sps:$4 sm:$0xff] (!%p277_p7)   ;;  %v638_v23 = vld [vmem:[%s285_s12 + $0x20] ss:$8 sps:$4 sm:$0xff] (!%p277_p7)  }
  0x2a   : > { %422 = vmatpush1.bf16.msra.mxu0 (!%p277_p7), %v632_v19  ;;  %v639_v24 = vld [vmem:[%s285_s12 + $0x34] ss:$8 sps:$4 sm:$0xff] (!%p277_p7)   ;;  %v641_v25 = vld [vmem:[%s285_s12 + $0x30] ss:$8 sps:$4 sm:$0xff] (!%p277_p7)   ;;  %v642_v26 = vld [vmem:[%s285_s12 + $0x44] ss:$8 sps:$4 sm:$0xff] (!%p277_p7)  }
  0x2b   : > { %423 = vmatprep.subr.bf16.mxu0 (!%p277_p7), %v633_v20  ;;  %v644_v27 = vld [vmem:[%s285_s12 + $0x40] ss:$8 sps:$4 sm:$0xff] (!%p277_p7)   ;;  %v645_v28 = vld [vmem:[%s285_s12 + $0x54] ss:$8 sps:$4 sm:$0xff] (!%p277_p7)   ;;  %v647_v29 = vld [vmem:[%s285_s12 + $0x50] ss:$8 sps:$4 sm:$0xff] (!%p277_p7)  }
  0x2c   : > { %v648_v30 = vld [vmem:[%s285_s12 + $0x64] ss:$8 sps:$4 sm:$0xff] (!%p277_p7)   ;;  %v650_v31 = vld [vmem:[%s285_s12 + $0x60] ss:$8 sps:$4 sm:$0xff] (!%p277_p7)   ;;  %v651_v32 = vld [vmem:[%s285_s12 + $0x74] ss:$8 sps:$4 sm:$0xff] (!%p277_p7)  }
  0x2d   : > { %v653_v33 = vld [vmem:[%s285_s12 + $0x70] ss:$8 sps:$4 sm:$0xff]   ;;  %s598_s16 = sshll.u32 %s726_s21, 8  ;;  %s817_s15 = smov (!%p312_p8, %s580_s15), 7  ;;  %v467_v38 = vadd.s32 128, %v466_v36 }
  0x2e   : > { %424 = vmatpush1.bf16.msra.mxu0 %v635_v21  ;;  %v468_v37 = vstv %s598_s16  ;;  %s581_s17 = sshll.u32 %s817_s15, 3  ;;  %p599_p9 = scmp.ne.s32.totalorder %s726_s21, 0 }
  0x2f   : > { %425 = vmatprep.subr.bf16.mxu0 %v636_v22  ;;  %v469_v39 = vadd.s32 %v468_v37, %v466_v36  ;;  %v470_v40 = vadd.s32 %v468_v37, %v467_v38  ;;  %s315_s23 = scalar_lea.vmem %s810_s3, %s581_s17  ;;  %vm479_vm2 = vcmask (!%p599_p9), 7168   ;;  %v679_v50 = vmov (!%p599_p9), 0.0  }
  0x30   : > { %480 = vst.msk [vmem:[%s811_s4] sm:$0xff] (!%p599_p9), %vm479_vm2, %v679_v50  ;;  %481 = vst.msk [vmem:[%s812_s5] sm:$0xff] (!%p599_p9), %vm479_vm2, %v679_v50 }
  0x31   : > { %vm471_vm0 = vcmp.lt.s32.totalorder %v469_v39, 1024  ;;  %vm472_vm1 = vcmp.lt.s32.totalorder %v470_v40, 1024 }
  0x32   : > { %426 = vmatpush1.bf16.msra.mxu0 %v638_v23 }
  0x33   : > { %427 = vmatprep.subr.bf16.mxu0 %v639_v24 }
  0x36   : > { %428 = vmatpush1.bf16.msra.mxu0 %v641_v25 }
  0x37   : > { %429 = vmatprep.subr.bf16.mxu0 %v642_v26 }
  0x3a   : > { %430 = vmatpush1.bf16.msra.mxu0 %v644_v27 }
  0x3b   : > { %431 = vmatprep.subr.bf16.mxu0 %v645_v28 }
  0x3e   : > { %432 = vmatpush1.bf16.msra.mxu0 %v647_v29 }
  0x3f   : > { %433 = vmatprep.subr.bf16.mxu0 %v648_v30 }
  0x42   : > { %434 = vmatpush1.bf16.msra.mxu0 %v650_v31 }
  0x43   : > { %435 = vmatprep.subr.bf16.mxu0 %v651_v32 }
  0x46   : > { %436 = vmatpush1.bf16.msra.mxu0 %v653_v33 }
  0x49   : > { %454 = vmatmul.mubr.bf16.vlgmr.msra.gmra.mrb[0].mxu0 %v318_v34 }
  0xa6   : > { %v339_v41 = vpop.permute.xlu0 %338 }
 0x11a   : > { %478 = sbr.rel (%p599_p9) target bundleno = 289 (0x121), region = 74 }
 0x11c   : > { %v455_v42 = vpop.f32.mrb[0].mxu0 }
 0x11d   : > { %v456_v43 = vadd.f32 %v455_v42, %v339_v41  ;;  %v457_v44 = vpop.f32.mrb[1].mxu0 }
 0x11e   : > { %v458_v45 = vadd.f32 %v457_v44, %v339_v41  ;;  %v459_v46 = vpop.f32.mrb[2].mxu0 }
 0x11f   : > { %462 = vst [vmem:[%s315_s23] sm:$0xff] %v456_v43  ;;  %v473_v47 = vsel %vm471_vm0, %v456_v43, 0.0  ;;  %v460_v48 = vpop.f32.mrb[3].mxu0 }
 0x120   : > { %463 = vst [vmem:[%s315_s23 + $0x8] sm:$0xff] %v458_v45  ;;  %v474_v49 = vsel %vm472_vm1, %v458_v45, 0.0 }
 0x121 PF: > { %v483_v51 = vadd.f32 %v474_v49, %v473_v47  ;;  %v490_v52 = vmul.f32 %v473_v47, %v473_v47  ;;  %v491_v53 = vmul.f32 %v474_v49, %v474_v49  ;;  %v482_v55 = vld [vmem:[%s811_s4] sm:$0xff]  ;;  %vm487_vm3 = vcmask 7168  }
 0x122   : > { %v489_v58 = vld [vmem:[%s812_s5] sm:$0xff] }
 0x123   : > { %484 = vadd.xlane.f32.xlu0 %v483_v51  ;;  %v492_v54 = vadd.f32 %v491_v53, %v490_v52 }
 0x127   : > { %493 = vadd.xlane.f32.xlu0 %v492_v54 }
 0x1b0   : > { %v485_v56 = vpop.xlane.xlu0 %484 }
 0x1b1   : > { %v486_v57 = vadd.f32 %v485_v56, %v482_v55 }
 0x1b3   : > { %488 = vst.msk [vmem:[%s811_s4] sm:$0xff] %vm487_vm3, %v486_v57 }
 0x1b4   : > { %v494_v59 = vpop.xlane.xlu0 %493 }
 0x1b5   : > { %v495_v60 = vadd.f32 %v494_v59, %v489_v58 }
 0x1b7   : > { %496 = vst.msk [vmem:[%s812_s5] sm:$0xff] %vm487_vm3, %v495_v60 }
 0x1b8 PF: > { %p13_p10 = scmp.ge.s32.totalorder %s729_s22, 6   ;;  %s813_s18 = smov %s672_s19 }
 0x1b9   : > { %s814_s19 = smov %s738_s25  ;;  %s815_s20 = smov %s729_s22 }
 0x1ba   :  { %15 = sbr.rel (!%p13_p10) target bundleno = 2 (0x2), region = 125 }

</bundles_post_ra>
